<compile_context>
chip_gen: v6e
topology: v6e:2x2x1
jax: 0.10.0
libtpu: 0.0.40
codegen_flags: <defaults>
</compile_context>

<pallas_src>
import jax
import jax.numpy as jnp
import numpy as np
from jax.experimental import pallas as pl
from jax.experimental.pallas import tpu as pltpu


# ----------------------------- static constants ------------------------------

_BT_CONV_MAX = 32                   # max images per grid step in conv kernels
_TB_MLP_MAX = 512                   # max rows per grid step in the MLP kernel
_VMEM_LIMIT = 32 * 1024 * 1024      # scoped-VMEM cap, safe on v5e/v6e/v7x


def _round_up(x, m):
    return (x + m - 1) // m * m


def _conv_batch_tile(b):
    """Images per conv grid step.  For b >= 2 the tile is <= ceil(b/2) so the
    grid always has >= 2 steps (both TensorCores on v7x), capped at
    _BT_CONV_MAX so the per-step VMEM footprint stays small."""
    if b <= 1:
        return 1
    return min(_BT_CONV_MAX, _round_up(b, 2) // 2)


def _avgpool_matrix_t(in_hw, out_hw):
    """(in_hw^2, out_hw^2) f32 matrix: right-multiplying a (C, in_hw^2)
    row-major-flattened spatial map performs 2x2 / stride-2 average pooling.
    0.25 is exact in f32."""
    m = np.zeros((in_hw * in_hw, out_hw * out_hw), np.float32)
    for i in range(out_hw):
        for j in range(out_hw):
            p = i * out_hw + j
            for di in range(2):
                for dj in range(2):
                    m[(2 * i + di) * in_hw + (2 * j + dj), p] = 0.25
    return m


# ------------------------------ Pallas kernels --------------------------------

def conv_pool_kernel(p_ref, w_ref, b_ref, pool_ref, o_ref):
    """Fused conv (im2col matmul) + bias + ReLU + 2x2 average pool.
    Channels live in sublanes, spatial positions in lanes (lane-dense).

      p_ref    : (BT, K, S) bf16  im2col patches            (per-step block)
      w_ref    : (C, K)     bf16  conv weight, matmul form   [VMEM resident]
      b_ref    : (C, 1)     f32   conv bias                  [VMEM resident]
      pool_ref : (S, P)     f32   constant 0.25 pool matrix  [VMEM resident]
      o_ref    : (BT, C, P) bf16  pooled feature map (NCHW order per image)
    """
    bt = p_ref.shape[0]
    c = w_ref.shape[0]
    s = p_ref.shape[2]
    w = w_ref[...]
    pool_t = pool_ref[...]
    bias = jnp.broadcast_to(b_ref[...], (c, s))        # hoisted: one broadcast/step
    for i in range(bt):                                # static unroll over images
        z = jnp.dot(w, p_ref[i], preferred_element_type=jnp.float32)   # (C, S)
        z = jnp.maximum(z + bias, 0.0)                                  # f32 epilogue
        o_ref[i] = jnp.dot(z, pool_t,
                           preferred_element_type=jnp.float32).astype(o_ref.dtype)


def mlp_kernel(x_ref, w1_ref, b1_ref, w2_ref, b2_ref, w3_ref, b3_ref, o_ref):
    """fc1 -> relu -> fc2 -> relu -> fc3 on a (TB, 256) row tile.
    All hidden/output dims are zero-padded to 128 lanes, so every intermediate
    is lane-dense and every contraction is 128-aligned.  bf16 matmul operands,
    f32 accumulate / epilogues."""
    h = jnp.dot(x_ref[...], w1_ref[...], preferred_element_type=jnp.float32)
    h = jnp.maximum(h + b1_ref[...], 0.0).astype(jnp.bfloat16)
    h = jnp.dot(h, w2_ref[...], preferred_element_type=jnp.float32)
    h = jnp.maximum(h + b2_ref[...], 0.0).astype(jnp.bfloat16)
    h = jnp.dot(h, w3_ref[...], preferred_element_type=jnp.float32)
    o_ref[...] = h + b3_ref[...]


# --------------------------- pallas_call wrappers -----------------------------

def _conv_pool_stage(p, w, b, pool_t, bt):
    """Grid over batch tiles; activations tiled, weights/bias/pool resident."""
    bc, k, s = p.shape
    c = w.shape[0]
    pp = pool_t.shape[1]
    return pl.pallas_call(
        conv_pool_kernel,
        out_shape=jax.ShapeDtypeStruct((bc, c, pp), jnp.bfloat16),
        grid_spec=pltpu.PrefetchScalarGridSpec(
            num_scalar_prefetch=0,
            grid=(bc // bt,),
            in_specs=[
                pl.BlockSpec((bt, k, s), lambda i: (i, 0, 0)),
                pl.BlockSpec((c, k), lambda i: (0, 0)),
                pl.BlockSpec((c, 1), lambda i: (0, 0)),
                pl.BlockSpec((s, pp), lambda i: (0, 0)),
            ],
            out_specs=pl.BlockSpec((bt, c, pp), lambda i: (i, 0, 0)),
        ),
        compiler_params=pltpu.CompilerParams(
            dimension_semantics=("parallel",),
            vmem_limit_bytes=_VMEM_LIMIT,
        ),
    )(p, w, b, pool_t)


def _mlp_stage(x, w1, b1, w2, b2, w3, b3, tb):
    bm, kin = x.shape
    nout = w3.shape[1]
    return pl.pallas_call(
        mlp_kernel,
        out_shape=jax.ShapeDtypeStruct((bm, nout), jnp.float32),
        grid_spec=pltpu.PrefetchScalarGridSpec(
            num_scalar_prefetch=0,
            grid=(bm // tb,),
            in_specs=[
                pl.BlockSpec((tb, kin), lambda i: (i, 0)),
                pl.BlockSpec(w1.shape, lambda i: (0, 0)),
                pl.BlockSpec(b1.shape, lambda i: (0, 0)),
                pl.BlockSpec(w2.shape, lambda i: (0, 0)),
                pl.BlockSpec(b2.shape, lambda i: (0, 0)),
                pl.BlockSpec(w3.shape, lambda i: (0, 0)),
                pl.BlockSpec(b3.shape, lambda i: (0, 0)),
            ],
            out_specs=pl.BlockSpec((tb, nout), lambda i: (i, 0)),
        ),
        compiler_params=pltpu.CompilerParams(
            dimension_semantics=("parallel",),
            vmem_limit_bytes=_VMEM_LIMIT,
        ),
    )(x, w1, b1, w2, b2, w3, b3)


# ----------------------------- parameter prep --------------------------------

def prepare_params(params):
    """One-time restructuring of PyTorch-layout parameters into the matmul
    form the kernels consume (channels-major conv weights, 128-padded MLP)."""
    (w1, b1, w2, b2, fw1, fb1, fw2, fb2, fw3, fb3) = params
    bf16 = jnp.bfloat16
    # conv weights as (C_out, K) with column order matching the im2col rows:
    #   conv1: K = ki*5 + kj ;  conv2: K = c_in*25 + ki*5 + kj  (OIHW flatten)
    w1e = w1.reshape(6, 25).astype(bf16)                                   # (6, 25)
    w2e = w2.reshape(16, 150).astype(bf16)                                 # (16,150)
    # fc weights transposed to (K, N); N (and K where needed) zero-padded to 128.
    fw1p = jnp.zeros((256, 128), bf16).at[:, :120].set(jnp.transpose(fw1).astype(bf16))
    fb1p = jnp.zeros((1, 128), jnp.float32).at[0, :120].set(fb1)
    fw2p = jnp.zeros((128, 128), bf16).at[:120, :84].set(jnp.transpose(fw2).astype(bf16))
    fb2p = jnp.zeros((1, 128), jnp.float32).at[0, :84].set(fb2)
    fw3p = jnp.zeros((128, 128), bf16).at[:84, :10].set(jnp.transpose(fw3).astype(bf16))
    fb3p = jnp.zeros((1, 128), jnp.float32).at[0, :10].set(fb3)
    return dict(
        w1e=w1e, b1=b1.reshape(6, 1).astype(jnp.float32),
        w2e=w2e, b2=b2.reshape(16, 1).astype(jnp.float32),
        fw1=fw1p, fb1=fb1p, fw2=fw2p, fb2=fb2p, fw3=fw3p, fb3=fb3p,
        pool1t=jnp.asarray(_avgpool_matrix_t(24, 12)),                     # (576,144) f32
        pool2t=jnp.asarray(_avgpool_matrix_t(8, 4)),                       # (64, 16)  f32
    )


# ------------------------------ forward (glue) --------------------------------

@jax.jit
def quant_lenet5_forward(x_nchw, prep):
    """NCHW (B, 1, 28, 28) float input -> (B, 10) float logits."""
    B = x_nchw.shape[0]

    # QuantStub: identity for a float (non-converted) model.
    x = x_nchw[:, 0].astype(jnp.bfloat16)                                  # (B,28,28)

    bt = _conv_batch_tile(B)
    bc = _round_up(B, bt)                      # >= 2 grid steps whenever B >= 2

    # conv1 im2col, transposed (K, S) layout: row k = ki*5+kj, lane s = oh*24+ow.
    p1 = jnp.stack([x[:, ki:ki + 24, kj:kj + 24].reshape(B, 576)
                    for ki in range(5) for kj in range(5)], axis=1)        # (B,25,576)
    if bc != B:
        p1 = jnp.pad(p1, ((0, bc - B), (0, 0), (0, 0)))

    # conv1 + relu + avgpool (fused Pallas kernel)
    a1 = _conv_pool_stage(p1, prep["w1e"], prep["b1"], prep["pool1t"], bt)  # (bc,6,144)

    # conv2 im2col on the pooled (6,12,12) map: row = c*25 + ki*5 + kj, lane = oh*8+ow.
    # TODO(synk): conv2 im2col stays in the wrapper; building overlapping 8x8
    # windows in-kernel needs unaligned lane slices / sublane<->lane reshapes
    # that Mosaic relayouts poorly at this size.
    a1 = a1.reshape(bc, 6, 12, 12)
    p2 = jnp.stack([a1[:, :, ki:ki + 8, kj:kj + 8].reshape(bc, 6, 64)
                    for ki in range(5) for kj in range(5)], axis=2)        # (bc,6,25,64)
    p2 = p2.reshape(bc, 150, 64)

    # conv2 + relu + avgpool (same fused kernel)
    g = _conv_pool_stage(p2, prep["w2e"], prep["b2"], prep["pool2t"], bt)   # (bc,16,16)

    # Channels-in-sublanes output: this reshape IS the PyTorch NCHW flatten
    # (index = c*16 + h*4 + w); no transpose needed.
    flat = g.reshape(bc, 256)

    # MLP row tiling: pad rows to a multiple of 16 so the tile is sublane
    # aligned and the grid has >= 2 steps (v7x megacore).
    bm = _round_up(bc, 16)
    tb = bm // 2 if bm <= 2 * _TB_MLP_MAX else _TB_MLP_MAX
    bm = _round_up(bm, tb)
    if bm != bc:
        flat = jnp.pad(flat, ((0, bm - bc), (0, 0)))

    # fc1 -> relu -> fc2 -> relu -> fc3 (single Pallas kernel, lane-dense out)
    logits = _mlp_stage(flat, prep["fw1"], prep["fb1"], prep["fw2"],
                        prep["fb2"], prep["fw3"], prep["fb3"], tb)          # (bm,128)

    # DeQuantStub: identity.  Drop batch / lane padding.
    return logits[:B, :10]


# --------------------------- params / reference -------------------------------

def init_params(key):
    ks = jax.random.split(key, 10)

    def w(k, shape, fan_in):
        return jax.random.normal(k, shape, jnp.float32) / jnp.sqrt(fan_in)

    w1 = w(ks[0], (6, 1, 5, 5), 25.0)
    b1 = 0.1 * jax.random.normal(ks[1], (6,), jnp.float32)
    w2 = w(ks[2], (16, 6, 5, 5), 150.0)
    b2 = 0.1 * jax.random.normal(ks[3], (16,), jnp.float32)
    fw1 = w(ks[4], (120, 256), 256.0)
    fb1 = 0.1 * jax.random.normal(ks[5], (120,), jnp.float32)
    fw2 = w(ks[6], (84, 120), 120.0)
    fb2 = 0.1 * jax.random.normal(ks[7], (84,), jnp.float32)
    fw3 = w(ks[8], (10, 84), 84.0)
    fb3 = 0.1 * jax.random.normal(ks[9], (10,), jnp.float32)
    return (w1, b1, w2, b2, fw1, fb1, fw2, fb2, fw3, fb3)


def reference_forward(x_nchw, params):
    """Pure-JAX f32 reference matching the PyTorch forward (NCHW)."""
    (w1, b1, w2, b2, fw1, fb1, fw2, fb2, fw3, fb3) = params
    dn = ('NCHW', 'OIHW', 'NCHW')

    def avgpool2(y):
        s = jax.lax.reduce_window(y, 0.0, jax.lax.add,
                                  (1, 1, 2, 2), (1, 1, 2, 2), 'VALID')
        return s / 4.0

    y = jax.lax.conv_general_dilated(x_nchw, w1, (1, 1), 'VALID',
                                     dimension_numbers=dn)
    y = jnp.maximum(y + b1[None, :, None, None], 0.0)
    y = avgpool2(y)
    y = jax.lax.conv_general_dilated(y, w2, (1, 1), 'VALID',
                                     dimension_numbers=dn)
    y = jnp.maximum(y + b2[None, :, None, None], 0.0)
    y = avgpool2(y)
    y = y.reshape(y.shape[0], -1)
    y = jnp.maximum(y @ fw1.T + fb1, 0.0)
    y = jnp.maximum(y @ fw2.T + fb2, 0.0)
    y = y @ fw3.T + fb3
    return y


# ----------------------------------- main --------------------------------------

if __name__ == "__main__":
    key = jax.random.PRNGKey(0)
    kx, kp = jax.random.split(key)
    x = jax.random.normal(kx, (2, 1, 28, 28), jnp.float32)   # B=2, 1x28x28
    params = init_params(kp)
    prep = prepare_params(params)

    out = jax.block_until_ready(quant_lenet5_forward(x, prep))

    ref = reference_forward(x, params)
    err = float(jnp.max(jnp.abs(out - ref)))
    assert out.shape == (2, 10), out.shape
    assert bool(jnp.all(jnp.isfinite(out)))
    # Error budget for bf16 MXU operands with f32 accumulate (observed ~1e-2).
    assert err < 5e-2, f"mismatch vs pure-JAX reference: max abs err = {err}"
    print("KERNEL_OK")
</pallas_src>

<mosaic_0001>
module attributes {stable_mosaic.version = 11 : i64} {
  func.func @conv_pool_kernel(%arg0: i32, %arg1: memref<1x25x576xbf16, #tpu.memory_space<vmem>>, %arg2: memref<6x25xbf16, #tpu.memory_space<vmem>>, %arg3: memref<6x1xf32, #tpu.memory_space<vmem>>, %arg4: memref<576x144xf32, #tpu.memory_space<vmem>>, %arg5: memref<1x6x144xbf16, #tpu.memory_space<vmem>>) attributes {dimension_semantics = [#tpu.dimension_semantics<parallel>], iteration_bounds = array<i64: 2>, scalar_prefetch = 0 : i64, scratch_operands = 0 : i64, tpu.core_type = #tpu.core_type<tc>, window_params = [{transform_indices = @transform_0, window_bounds = array<i64: 1, 25, 576>}, {pipeline_mode = #tpu.pipeline_mode<synchronous>, transform_indices = @transform_1, window_bounds = array<i64: 6, 25>}, {pipeline_mode = #tpu.pipeline_mode<synchronous>, transform_indices = @transform_2, window_bounds = array<i64: 6, 1>}, {pipeline_mode = #tpu.pipeline_mode<synchronous>, transform_indices = @transform_3, window_bounds = array<i64: 576, 144>}, {transform_indices = @transform_4, window_bounds = array<i64: 1, 6, 144>}]} {
    %c0 = arith.constant 0 : index
    %c0_0 = arith.constant 0 : index
    %0 = vector.load %arg2[%c0, %c0_0] : memref<6x25xbf16, #tpu.memory_space<vmem>>, vector<6x25xbf16>
    %c0_1 = arith.constant 0 : index
    %c0_2 = arith.constant 0 : index
    %1 = vector.load %arg4[%c0_1, %c0_2] : memref<576x144xf32, #tpu.memory_space<vmem>>, vector<576x144xf32>
    %c0_3 = arith.constant 0 : index
    %c0_4 = arith.constant 0 : index
    %2 = vector.load %arg3[%c0_3, %c0_4] : memref<6x1xf32, #tpu.memory_space<vmem>>, vector<6x1xf32>
    %3 = vector.shape_cast %2 : vector<6x1xf32> to vector<6x1xf32>
    %4 = vector.broadcast %3 : vector<6x1xf32> to vector<6x576xf32>
    %c0_5 = arith.constant 0 : index
    %c0_6 = arith.constant 0 : index
    %c0_7 = arith.constant 0 : index
    %5 = vector.load %arg1[%c0_5, %c0_6, %c0_7] : memref<1x25x576xbf16, #tpu.memory_space<vmem>>, vector<1x25x576xbf16>
    %6 = vector.shape_cast %5 : vector<1x25x576xbf16> to vector<25x576xbf16>
    %cst = arith.constant dense<0.000000e+00> : vector<6x576xf32>
    %7 = tpu.matmul %0, %6, %cst {dimension_numbers = #tpu.dot_dimension_numbers<[1], [0], [0], [1], [0, 0, 1, 1], [], []>} : vector<6x25xbf16>, vector<25x576xbf16>, vector<6x576xf32> -> vector<6x576xf32>
    %8 = arith.addf %7, %4 : vector<6x576xf32>
    %cst_8 = arith.constant 0.000000e+00 : f32
    %9 = vector.broadcast %cst_8 : f32 to vector<6x576xf32>
    %10 = arith.maximumf %8, %9 : vector<6x576xf32>
    %cst_9 = arith.constant dense<0.000000e+00> : vector<6x144xf32>
    %11 = tpu.matmul %10, %1, %cst_9 {dimension_numbers = #tpu.dot_dimension_numbers<[1], [0], [0], [1], [0, 0, 1, 1], [], []>} : vector<6x576xf32>, vector<576x144xf32>, vector<6x144xf32> -> vector<6x144xf32>
    %12 = arith.truncf %11 : vector<6x144xf32> to vector<6x144xbf16>
    %c0_10 = arith.constant 0 : index
    %c0_11 = arith.constant 0 : index
    %c0_12 = arith.constant 0 : index
    %13 = vector.load %arg5[%c0_10, %c0_11, %c0_12] : memref<1x6x144xbf16, #tpu.memory_space<vmem>>, vector<1x6x144xbf16>
    %14 = vector.shape_cast %13 : vector<1x6x144xbf16> to vector<6x144xbf16>
    %15 = vector.shape_cast %12 : vector<6x144xbf16> to vector<1x6x144xbf16>
    tpu.vector_store %arg5[%c0_10, %c0_11, %c0_12], %15 {strides = array<i32>} : memref<1x6x144xbf16, #tpu.memory_space<vmem>>, vector<1x6x144xbf16>,
    return
  }
  func.func @transform_0(%arg0: i32) -> (i32, i32, i32) {
    %c0_i32 = arith.constant 0 : i32
    %c0_i32_0 = arith.constant 0 : i32
    %c0_i32_1 = arith.constant 0 : i32
    return %arg0, %c0_i32, %c0_i32_0 : i32, i32, i32
  }
  func.func @transform_1(%arg0: i32) -> (i32, i32) {
    %c0_i32 = arith.constant 0 : i32
    %c0_i32_0 = arith.constant 0 : i32
    %c0_i32_1 = arith.constant 0 : i32
    return %c0_i32, %c0_i32_0 : i32, i32
  }
  func.func @transform_2(%arg0: i32) -> (i32, i32) {
    %c0_i32 = arith.constant 0 : i32
    %c0_i32_0 = arith.constant 0 : i32
    %c0_i32_1 = arith.constant 0 : i32
    return %c0_i32, %c0_i32_0 : i32, i32
  }
  func.func @transform_3(%arg0: i32) -> (i32, i32) {
    %c0_i32 = arith.constant 0 : i32
    %c0_i32_0 = arith.constant 0 : i32
    %c0_i32_1 = arith.constant 0 : i32
    return %c0_i32, %c0_i32_0 : i32, i32
  }
  func.func @transform_4(%arg0: i32) -> (i32, i32, i32) {
    %c0_i32 = arith.constant 0 : i32
    %c0_i32_0 = arith.constant 0 : i32
    %c0_i32_1 = arith.constant 0 : i32
    return %arg0, %c0_i32, %c0_i32_0 : i32, i32, i32
  }
}

module attributes {stable_mosaic.version = 11 : i64} {
  func.func @conv_pool_kernel(%arg0: i32, %arg1: memref<1x150x64xbf16, #tpu.memory_space<vmem>>, %arg2: memref<16x150xbf16, #tpu.memory_space<vmem>>, %arg3: memref<16x1xf32, #tpu.memory_space<vmem>>, %arg4: memref<64x16xf32, #tpu.memory_space<vmem>>, %arg5: memref<1x16x16xbf16, #tpu.memory_space<vmem>>) attributes {dimension_semantics = [#tpu.dimension_semantics<parallel>], iteration_bounds = array<i64: 2>, scalar_prefetch = 0 : i64, scratch_operands = 0 : i64, tpu.core_type = #tpu.core_type<tc>, window_params = [{transform_indices = @transform_0, window_bounds = array<i64: 1, 150, 64>}, {pipeline_mode = #tpu.pipeline_mode<synchronous>, transform_indices = @transform_1, window_bounds = array<i64: 16, 150>}, {pipeline_mode = #tpu.pipeline_mode<synchronous>, transform_indices = @transform_2, window_bounds = array<i64: 16, 1>}, {pipeline_mode = #tpu.pipeline_mode<synchronous>, transform_indices = @transform_3, window_bounds = array<i64: 64, 16>}, {transform_indices = @transform_4, window_bounds = array<i64: 1, 16, 16>}]} {
    %c0 = arith.constant 0 : index
    %c0_0 = arith.constant 0 : index
    %0 = vector.load %arg2[%c0, %c0_0] : memref<16x150xbf16, #tpu.memory_space<vmem>>, vector<16x150xbf16>
    %c0_1 = arith.constant 0 : index
    %c0_2 = arith.constant 0 : index
    %1 = vector.load %arg4[%c0_1, %c0_2] : memref<64x16xf32, #tpu.memory_space<vmem>>, vector<64x16xf32>
    %c0_3 = arith.constant 0 : index
    %c0_4 = arith.constant 0 : index
    %2 = vector.load %arg3[%c0_3, %c0_4] : memref<16x1xf32, #tpu.memory_space<vmem>>, vector<16x1xf32>
    %3 = vector.shape_cast %2 : vector<16x1xf32> to vector<16x1xf32>
    %4 = vector.broadcast %3 : vector<16x1xf32> to vector<16x64xf32>
    %c0_5 = arith.constant 0 : index
    %c0_6 = arith.constant 0 : index
    %c0_7 = arith.constant 0 : index
    %5 = vector.load %arg1[%c0_5, %c0_6, %c0_7] : memref<1x150x64xbf16, #tpu.memory_space<vmem>>, vector<1x150x64xbf16>
    %6 = vector.shape_cast %5 : vector<1x150x64xbf16> to vector<150x64xbf16>
    %cst = arith.constant dense<0.000000e+00> : vector<16x64xf32>
    %7 = tpu.matmul %0, %6, %cst {dimension_numbers = #tpu.dot_dimension_numbers<[1], [0], [0], [1], [0, 0, 1, 1], [], []>} : vector<16x150xbf16>, vector<150x64xbf16>, vector<16x64xf32> -> vector<16x64xf32>
    %8 = arith.addf %7, %4 : vector<16x64xf32>
    %cst_8 = arith.constant 0.000000e+00 : f32
    %9 = vector.broadcast %cst_8 : f32 to vector<16x64xf32>
    %10 = arith.maximumf %8, %9 : vector<16x64xf32>
    %cst_9 = arith.constant dense<0.000000e+00> : vector<16x16xf32>
    %11 = tpu.matmul %10, %1, %cst_9 {dimension_numbers = #tpu.dot_dimension_numbers<[1], [0], [0], [1], [0, 0, 1, 1], [], []>} : vector<16x64xf32>, vector<64x16xf32>, vector<16x16xf32> -> vector<16x16xf32>
    %12 = arith.truncf %11 : vector<16x16xf32> to vector<16x16xbf16>
    %c0_10 = arith.constant 0 : index
    %c0_11 = arith.constant 0 : index
    %c0_12 = arith.constant 0 : index
    %13 = vector.load %arg5[%c0_10, %c0_11, %c0_12] : memref<1x16x16xbf16, #tpu.memory_space<vmem>>, vector<1x16x16xbf16>
    %14 = vector.shape_cast %13 : vector<1x16x16xbf16> to vector<16x16xbf16>
    %15 = vector.shape_cast %12 : vector<16x16xbf16> to vector<1x16x16xbf16>
    tpu.vector_store %arg5[%c0_10, %c0_11, %c0_12], %15 {strides = array<i32>} : memref<1x16x16xbf16, #tpu.memory_space<vmem>>, vector<1x16x16xbf16>,
    return
  }
  func.func @transform_0(%arg0: i32) -> (i32, i32, i32) {
    %c0_i32 = arith.constant 0 : i32
    %c0_i32_0 = arith.constant 0 : i32
    %c0_i32_1 = arith.constant 0 : i32
    return %arg0, %c0_i32, %c0_i32_0 : i32, i32, i32
  }
  func.func @transform_1(%arg0: i32) -> (i32, i32) {
    %c0_i32 = arith.constant 0 : i32
    %c0_i32_0 = arith.constant 0 : i32
    %c0_i32_1 = arith.constant 0 : i32
    return %c0_i32, %c0_i32_0 : i32, i32
  }
  func.func @transform_2(%arg0: i32) -> (i32, i32) {
    %c0_i32 = arith.constant 0 : i32
    %c0_i32_0 = arith.constant 0 : i32
    %c0_i32_1 = arith.constant 0 : i32
    return %c0_i32, %c0_i32_0 : i32, i32
  }
  func.func @transform_3(%arg0: i32) -> (i32, i32) {
    %c0_i32 = arith.constant 0 : i32
    %c0_i32_0 = arith.constant 0 : i32
    %c0_i32_1 = arith.constant 0 : i32
    return %c0_i32, %c0_i32_0 : i32, i32
  }
  func.func @transform_4(%arg0: i32) -> (i32, i32, i32) {
    %c0_i32 = arith.constant 0 : i32
    %c0_i32_0 = arith.constant 0 : i32
    %c0_i32_1 = arith.constant 0 : i32
    return %arg0, %c0_i32, %c0_i32_0 : i32, i32, i32
  }
}

module attributes {stable_mosaic.version = 11 : i64} {
  func.func @mlp_kernel(%arg0: i32, %arg1: memref<8x256xbf16, #tpu.memory_space<vmem>>, %arg2: memref<256x128xbf16, #tpu.memory_space<vmem>>, %arg3: memref<1x128xf32, #tpu.memory_space<vmem>>, %arg4: memref<128x128xbf16, #tpu.memory_space<vmem>>, %arg5: memref<1x128xf32, #tpu.memory_space<vmem>>, %arg6: memref<128x128xbf16, #tpu.memory_space<vmem>>, %arg7: memref<1x128xf32, #tpu.memory_space<vmem>>, %arg8: memref<8x128xf32, #tpu.memory_space<vmem>>) attributes {dimension_semantics = [#tpu.dimension_semantics<parallel>], iteration_bounds = array<i64: 2>, scalar_prefetch = 0 : i64, scratch_operands = 0 : i64, tpu.core_type = #tpu.core_type<tc>, window_params = [{transform_indices = @transform_0, window_bounds = array<i64: 8, 256>}, {pipeline_mode = #tpu.pipeline_mode<synchronous>, transform_indices = @transform_1, window_bounds = array<i64: 256, 128>}, {pipeline_mode = #tpu.pipeline_mode<synchronous>, transform_indices = @transform_2, window_bounds = array<i64: 1, 128>}, {pipeline_mode = #tpu.pipeline_mode<synchronous>, transform_indices = @transform_3, window_bounds = array<i64: 128, 128>}, {pipeline_mode = #tpu.pipeline_mode<synchronous>, transform_indices = @transform_4, window_bounds = array<i64: 1, 128>}, {pipeline_mode = #tpu.pipeline_mode<synchronous>, transform_indices = @transform_5, window_bounds = array<i64: 128, 128>}, {pipeline_mode = #tpu.pipeline_mode<synchronous>, transform_indices = @transform_6, window_bounds = array<i64: 1, 128>}, {transform_indices = @transform_7, window_bounds = array<i64: 8, 128>}]} {
    %c0 = arith.constant 0 : index
    %c0_0 = arith.constant 0 : index
    %0 = vector.load %arg1[%c0, %c0_0] : memref<8x256xbf16, #tpu.memory_space<vmem>>, vector<8x256xbf16>
    %c0_1 = arith.constant 0 : index
    %c0_2 = arith.constant 0 : index
    %1 = vector.load %arg2[%c0_1, %c0_2] : memref<256x128xbf16, #tpu.memory_space<vmem>>, vector<256x128xbf16>
    %cst = arith.constant dense<0.000000e+00> : vector<8x128xf32>
    %2 = tpu.matmul %0, %1, %cst {dimension_numbers = #tpu.dot_dimension_numbers<[1], [0], [0], [1], [0, 0, 1, 1], [], []>} : vector<8x256xbf16>, vector<256x128xbf16>, vector<8x128xf32> -> vector<8x128xf32>
    %c0_3 = arith.constant 0 : index
    %c0_4 = arith.constant 0 : index
    %3 = vector.load %arg3[%c0_3, %c0_4] : memref<1x128xf32, #tpu.memory_space<vmem>>, vector<1x128xf32>
    %4 = vector.broadcast %3 : vector<1x128xf32> to vector<8x128xf32>
    %5 = arith.addf %2, %4 : vector<8x128xf32>
    %cst_5 = arith.constant 0.000000e+00 : f32
    %6 = vector.broadcast %cst_5 : f32 to vector<8x128xf32>
    %7 = arith.maximumf %5, %6 : vector<8x128xf32>
    %8 = arith.truncf %7 : vector<8x128xf32> to vector<8x128xbf16>
    %c0_6 = arith.constant 0 : index
    %c0_7 = arith.constant 0 : index
    %9 = vector.load %arg4[%c0_6, %c0_7] : memref<128x128xbf16, #tpu.memory_space<vmem>>, vector<128x128xbf16>
    %cst_8 = arith.constant dense<0.000000e+00> : vector<8x128xf32>
    %10 = tpu.matmul %8, %9, %cst_8 {dimension_numbers = #tpu.dot_dimension_numbers<[1], [0], [0], [1], [0, 0, 1, 1], [], []>} : vector<8x128xbf16>, vector<128x128xbf16>, vector<8x128xf32> -> vector<8x128xf32>
    %c0_9 = arith.constant 0 : index
    %c0_10 = arith.constant 0 : index
    %11 = vector.load %arg5[%c0_9, %c0_10] : memref<1x128xf32, #tpu.memory_space<vmem>>, vector<1x128xf32>
    %12 = vector.broadcast %11 : vector<1x128xf32> to vector<8x128xf32>
    %13 = arith.addf %10, %12 : vector<8x128xf32>
    %cst_11 = arith.constant 0.000000e+00 : f32
    %14 = vector.broadcast %cst_11 : f32 to vector<8x128xf32>
    %15 = arith.maximumf %13, %14 : vector<8x128xf32>
    %16 = arith.truncf %15 : vector<8x128xf32> to vector<8x128xbf16>
    %c0_12 = arith.constant 0 : index
    %c0_13 = arith.constant 0 : index
    %17 = vector.load %arg6[%c0_12, %c0_13] : memref<128x128xbf16, #tpu.memory_space<vmem>>, vector<128x128xbf16>
    %cst_14 = arith.constant dense<0.000000e+00> : vector<8x128xf32>
    %18 = tpu.matmul %16, %17, %cst_14 {dimension_numbers = #tpu.dot_dimension_numbers<[1], [0], [0], [1], [0, 0, 1, 1], [], []>} : vector<8x128xbf16>, vector<128x128xbf16>, vector<8x128xf32> -> vector<8x128xf32>
    %c0_15 = arith.constant 0 : index
    %c0_16 = arith.constant 0 : index
    %19 = vector.load %arg7[%c0_15, %c0_16] : memref<1x128xf32, #tpu.memory_space<vmem>>, vector<1x128xf32>
    %20 = vector.broadcast %19 : vector<1x128xf32> to vector<8x128xf32>
    %21 = arith.addf %18, %20 : vector<8x128xf32>
    %c0_17 = arith.constant 0 : index
    %c0_18 = arith.constant 0 : index
    %22 = vector.load %arg8[%c0_17, %c0_18] : memref<8x128xf32, #tpu.memory_space<vmem>>, vector<8x128xf32>
    tpu.vector_store %arg8[%c0_17, %c0_18], %21 {strides = array<i32>} : memref<8x128xf32, #tpu.memory_space<vmem>>, vector<8x128xf32>,
    return
  }
  func.func @transform_0(%arg0: i32) -> (i32, i32) {
    %c0_i32 = arith.constant 0 : i32
    %c0_i32_0 = arith.constant 0 : i32
    return %arg0, %c0_i32 : i32, i32
  }
  func.func @transform_1(%arg0: i32) -> (i32, i32) {
    %c0_i32 = arith.constant 0 : i32
    %c0_i32_0 = arith.constant 0 : i32
    %c0_i32_1 = arith.constant 0 : i32
    return %c0_i32, %c0_i32_0 : i32, i32
  }
  func.func @transform_2(%arg0: i32) -> (i32, i32) {
    %c0_i32 = arith.constant 0 : i32
    %c0_i32_0 = arith.constant 0 : i32
    %c0_i32_1 = arith.constant 0 : i32
    return %c0_i32, %c0_i32_0 : i32, i32
  }
  func.func @transform_3(%arg0: i32) -> (i32, i32) {
    %c0_i32 = arith.constant 0 : i32
    %c0_i32_0 = arith.constant 0 : i32
    %c0_i32_1 = arith.constant 0 : i32
    return %c0_i32, %c0_i32_0 : i32, i32
  }
  func.func @transform_4(%arg0: i32) -> (i32, i32) {
    %c0_i32 = arith.constant 0 : i32
    %c0_i32_0 = arith.constant 0 : i32
    %c0_i32_1 = arith.constant 0 : i32
    return %c0_i32, %c0_i32_0 : i32, i32
  }
  func.func @transform_5(%arg0: i32) -> (i32, i32) {
    %c0_i32 = arith.constant 0 : i32
    %c0_i32_0 = arith.constant 0 : i32
    %c0_i32_1 = arith.constant 0 : i32
    return %c0_i32, %c0_i32_0 : i32, i32
  }
  func.func @transform_6(%arg0: i32) -> (i32, i32) {
    %c0_i32 = arith.constant 0 : i32
    %c0_i32_0 = arith.constant 0 : i32
    %c0_i32_1 = arith.constant 0 : i32
    return %c0_i32, %c0_i32_0 : i32, i32
  }
  func.func @transform_7(%arg0: i32) -> (i32, i32) {
    %c0_i32 = arith.constant 0 : i32
    %c0_i32_0 = arith.constant 0 : i32
    return %arg0, %c0_i32 : i32, i32
  }
}

</mosaic_0001>

<bundles_post_ra>
// kernel: quant_lenet5_forward.3
= control target key start
LH: loop header
LB: loop body
LE: loop exit
PB: predicated region body
PF: predicated region fallthrough
CT: control target
= control target key end

     0   :  { %s946_s15 = smov 0   ;;  %s1424_s0 = inlined_call_operand.vmem [shape: bf16[2,25,576], index: 0, kind: input, shape index: {}]   ;;  %s1425_s1 = inlined_call_operand.vmem [shape: bf16[6,25], index: 1, kind: input, shape index: {}]   ;;  %s1426_s2 = inlined_call_operand.vmem [shape: f32[6,1], index: 2, kind: input, shape index: {}]   ;;  %s1427_s3 = inlined_call_operand.vmem [shape: f32[576,144], index: 3, kind: input, shape index: {}]   ;;  %s1428_s4 = inlined_call_operand.vmem [shape: bf16[2,6,144], index: 4, kind: output, shape index: {}]  }
   0x1 LB: > { %s843_s16 = sadd.s32 4294967295, %s915_s15   ;;  %p847_p0 = scmp.ge.s32.totalorder %s915_s15, 1  ;;  %s915_s15 = sphi %s946_s15, %s14_s15  }
   0x2   : > { %p162_p1 = scmp.lt.s32.totalorder %s915_s15, 3 }
   0x4   : > { %p163_p2 = pnand %p847_p0, %p162_p1 }
   0x5   : > { %p188_p3 = scmp.lt.s32.totalorder (!%p163_p2), %s843_s16, 1 }
   0x6   : > { %166 = sbr.rel (%p163_p2) target bundleno = 442 (0x1ba), region = 36 }
   0xb   : > { %vm413_vm0 = vcmask 1043456   ;;  %v917_v0 = vmov 0   ;;  %s1430_s16 = smov (!%p188_p3, %s843_s16), 1  ;;  %v344_v1 = vld [vmem:[%s1426_s2] sm:$0x3f]  ;;  %vm414_vm1 = vcmask 1044480  }
   0xc   : > { %464 = vmatprep.mubr.bf16.mxu0 %v917_v0  ;;  %505 = vmatprep.mubr.bf16.mxu1 %v917_v0  ;;  %v918_v2 = vmov 65535   ;;  %s881_s19 = smul.u32 80, %s1430_s16  ;;  %v231_v18 = vld [vmem:[%s1427_s3 + $0xf8] sm:$0xff]  ;;  %v199_v19 = vld [vmem:[%s1425_s1] sm:$0x7]  ;;  %vm409_vm2 = vcmask 203776  }
   0xd   : > { %894 = vset.pattern.permute.xlu0 %v917_v0  ;;  %v415_v3 = vsel %vm413_vm0, 4294967295, %v918_v2  ;;  %v919_v21 = vmov 0.0   ;;  %v230_v22 = vld [vmem:[%s1427_s3 + $0xf0] sm:$0xff]  ;;  %v229_v23 = vld [vmem:[%s1427_s3 + $0xe8] sm:$0xff]  ;;  %vm920_vm3 = vmmov 0   ;;  %v228_v25 = vld [vmem:[%s1427_s3 + $0xe0] sm:$0xff] }
   0xe   : > { %347 = vperm.xlu0 %894, %v344_v1   ;;  %s963_s22 = scalar_lea.vmem %s1424_s0, %s881_s19  ;;  %v416_v4 = vsel %vm414_vm1, %v415_v3, 0  ;;  %v227_v26 = vld [vmem:[%s1427_s3 + $0xd8] sm:$0xff]  ;;  %v226_v28 = vld [vmem:[%s1427_s3 + $0xd0] sm:$0xff]  ;;  %v225_v29 = vld [vmem:[%s1427_s3 + $0xc8] sm:$0xff]  ;;  %vm559_vm4 = vcmask 523264   ;;  %s868_s25 = sshll.u32 %s1430_s16, 3 }
   0xf   : > { %v895_v5 = vld [vmem:[%s963_s22 + $0x2c] ss:$20 sps:$4 sm:$0x1f]   ;;  %v897_v6 = vld [vmem:[%s963_s22 + $0x34] ss:$20 sps:$4 sm:$0x1f]   ;;  %s197_s28 = scalar_lea.vmem %s1428_s4, %s868_s25 }
  0x10   : > { %v421_v7 = vand.u32 %v895_v5, %v416_v4  ;;  %v899_v8 = vld [vmem:[%s963_s22 + $0x28] ss:$20 sps:$4 sm:$0x1f]   ;;  %v900_v9 = vld [vmem:[%s963_s22 + $0x30] ss:$20 sps:$4 sm:$0x1f]   ;;  %v427_v10 = vand.u32 %v897_v6, %v416_v4 }
  0x11   : > { %v901_v11 = vld [vmem:[%s963_s22 + $0x4] ss:$20 sps:$4 sm:$0xff]   ;;  %v418_v12 = vand.u32 %v899_v8, %v416_v4  ;;  %v424_v13 = vand.u32 %v900_v9, %v416_v4  ;;  %v903_v14 = vld [vmem:[%s963_s22 + $0xc] ss:$20 sps:$4 sm:$0xff]   ;;  %v906_v16 = vld [vmem:[%s963_s22 + $0x8] ss:$20 sps:$4 sm:$0xff]  }
  0x12   : > { %444 = vmatprep.subr.bf16.mxu0 %v421_v7  ;;  %485 = vmatprep.subr.bf16.mxu1 %v427_v10  ;;  %v905_v15 = vld [vmem:[%s963_s22] ss:$20 sps:$4 sm:$0xff]   ;;  %v907_v17 = vld [vmem:[%s963_s22 + $0x38] ss:$20 sps:$4 sm:$0x1f]   ;;  %vm784_vm5 = vcmask 1042432  }
  0x13   : > { %445 = vmatpush1.bf16.msra.mxu0 %v418_v12  ;;  %486 = vmatpush1.bf16.msra.mxu1 %v424_v13  ;;  %v430_v20 = vand.u32 %v907_v17, %v416_v4  ;;  %v908_v24 = vld [vmem:[%s963_s22 + $0x10] ss:$20 sps:$4 sm:$0xff]   ;;  %v295_v27 = vld [vmem:[%s1427_s3 + $0x2f8] sm:$0xff]  ;;  %v293_v33 = vld [vmem:[%s1427_s3 + $0x2e8] sm:$0xff]  ;;  %vm785_vm6 = vcmask 129028  }
  0x14   : > { %446 = vmatprep.subr.bf16.mxu0 %v901_v11  ;;  %487 = vmatprep.subr.bf16.mxu1 %v903_v14  ;;  %v224_v30 = vld [vmem:[%s1427_s3 + $0xc0] sm:$0xff]  ;;  %v294_v31 = vld [vmem:[%s1427_s3 + $0x2f0] sm:$0xff]  ;;  %v223_v32 = vld [vmem:[%s1427_s3 + $0xb8] sm:$0xff] }
  0x15   : > { %v222_v34 = vld [vmem:[%s1427_s3 + $0xb0] sm:$0xff]  ;;  %v292_v35 = vld [vmem:[%s1427_s3 + $0x2e0] sm:$0xff]  ;;  %v221_v36 = vld [vmem:[%s1427_s3 + $0xa8] sm:$0xff] }
  0x16   : > { %v291_v37 = vld [vmem:[%s1427_s3 + $0x2d8] sm:$0xff]  ;;  %v220_v38 = vld [vmem:[%s1427_s3 + $0xa0] sm:$0xff]  ;;  %v290_v39 = vld [vmem:[%s1427_s3 + $0x2d0] sm:$0xff] }
  0x17   : > { %447 = vmatpush1.bf16.msra.mxu0 %v905_v15  ;;  %488 = vmatpush1.bf16.msra.mxu1 %v906_v16  ;;  %v219_v40 = vld [vmem:[%s1427_s3 + $0x98] sm:$0xff]  ;;  %v289_v41 = vld [vmem:[%s1427_s3 + $0x2c8] sm:$0xff]  ;;  %v218_v42 = vld [vmem:[%s1427_s3 + $0x90] sm:$0xff] }
  0x18   : > { %873 = vmatprep.subr.bf16.mxu0 %v919_v21  ;;  %563 = vmatprep.subr.mxu1 %v231_v18  ;;  %v288_v43 = vld [vmem:[%s1427_s3 + $0x2c0] sm:$0xff]  ;;  %v217_v44 = vld [vmem:[%s1427_s3 + $0x88] sm:$0xff]  ;;  %v287_v45 = vld [vmem:[%s1427_s3 + $0x2b8] sm:$0xff] }
  0x19   : > { %v216_v46 = vld [vmem:[%s1427_s3 + $0x80] sm:$0xff]  ;;  %v286_v47 = vld [vmem:[%s1427_s3 + $0x2b0] sm:$0xff]  ;;  %v215_v48 = vld [vmem:[%s1427_s3 + $0x78] sm:$0xff] }
  0x1a   : > { %861 = vmatmul.mubr.msk.bf16.vlgmr.msra.gmra.mxu0 %vm409_vm2, %v199_v19  ;;  %862 = vmatmul.mubr.msk.bf16.vlgmr.msra.gmra.mxu1 %vm409_vm2, %v199_v19  ;;  %v285_v49 = vld [vmem:[%s1427_s3 + $0x2a8] sm:$0xff]  ;;  %v214_v50 = vld [vmem:[%s1427_s3 + $0x70] sm:$0xff]  ;;  %v284_v51 = vld [vmem:[%s1427_s3 + $0x2a0] sm:$0xff] }
  0x1b   : > { %874 = vmatpush3.bf16.msra.mxu0 %v430_v20  ;;  %877 = vmatprep.mubr.msk.bf16.mxu0 %vm920_vm3, %v919_v21  ;;  %v213_v52 = vld [vmem:[%s1427_s3 + $0x68] sm:$0xff]  ;;  %v283_v53 = vld [vmem:[%s1427_s3 + $0x298] sm:$0xff]  ;;  %v212_v54 = vld [vmem:[%s1427_s3 + $0x60] sm:$0xff] }
  0x1c   : > { %875 = vmatprep.subr.bf16.mxu0 %v919_v21  ;;  %564 = vmatpush1.msra.mxu1 %v230_v22  ;;  %v282_v55 = vld [vmem:[%s1427_s3 + $0x290] sm:$0xff]  ;;  %v211_v56 = vld [vmem:[%s1427_s3 + $0x58] sm:$0xff]  ;;  %v281_v57 = vld [vmem:[%s1427_s3 + $0x288] sm:$0xff] }
  0x1d   : > { %565 = vmatprep.subr.mxu1 %v229_v23  ;;  %v210_v58 = vld [vmem:[%s1427_s3 + $0x50] sm:$0xff]  ;;  %v280_v59 = vld [vmem:[%s1427_s3 + $0x280] sm:$0xff]  ;;  %v209_v60 = vld [vmem:[%s1427_s3 + $0x48] sm:$0xff] }
  0x1e   : > { %566 = vmatpush1.msra.mxu1 %v228_v25  ;;  %v279_v61 = vld [vmem:[%s1427_s3 + $0x278] sm:$0xff]  ;;  %v208_v62 = vld [vmem:[%s1427_s3 + $0x40] sm:$0xff]  ;;  %v278_v63 = vld [vmem:[%s1427_s3 + $0x270] sm:$0xff] }
  0x1f   : > { %876 = vmatpush3.bf16.msra.mxu0 %v908_v24  ;;  %567 = vmatprep.subr.mxu1 %v227_v26  ;;  %v207_v0 = vld [vmem:[%s1427_s3 + $0x38] sm:$0xff]  ;;  %v277_v1 = vld [vmem:[%s1427_s3 + $0x268] sm:$0xff]  ;;  %v206_v2 = vld [vmem:[%s1427_s3 + $0x30] sm:$0xff] }
  0x20   : > { %634 = vmatprep.subr.mxu0 %v295_v27  ;;  %568 = vmatpush1.msra.mxu1 %v226_v28  ;;  %v276_v3 = vld [vmem:[%s1427_s3 + $0x260] sm:$0xff]  ;;  %v205_v4 = vld [vmem:[%s1427_s3 + $0x28] sm:$0xff]  ;;  %v275_v5 = vld [vmem:[%s1427_s3 + $0x258] sm:$0xff] }
  0x21   : > { %569 = vmatprep.subr.mxu1 %v225_v29  ;;  %v204_v6 = vld [vmem:[%s1427_s3 + $0x20] sm:$0xff]  ;;  %v274_v7 = vld [vmem:[%s1427_s3 + $0x250] sm:$0xff]  ;;  %v203_v8 = vld [vmem:[%s1427_s3 + $0x18] sm:$0xff] }
  0x22   : > { %878 = vmatmul.mubr.msk.bf16.vlgmr.msra.gmra.mxu0 %vm409_vm2, %v199_v19  ;;  %570 = vmatpush1.msra.mxu1 %v224_v30  ;;  %v273_v9 = vld [vmem:[%s1427_s3 + $0x248] sm:$0xff]  ;;  %v202_v10 = vld [vmem:[%s1427_s3 + $0x10] sm:$0xff]  ;;  %v272_v11 = vld [vmem:[%s1427_s3 + $0x240] sm:$0xff] }
  0x23   : > { %635 = vmatpush1.msra.mxu0 %v294_v31  ;;  %571 = vmatprep.subr.mxu1 %v223_v32  ;;  %v201_v12 = vld [vmem:[%s1427_s3 + $0x8] sm:$0xff]  ;;  %v271_v13 = vld [vmem:[%s1427_s3 + $0x238] sm:$0xff]  ;;  %v200_v14 = vld [vmem:[%s1427_s3] sm:$0xff] }
  0x24   : > { %636 = vmatprep.subr.mxu0 %v293_v33  ;;  %572 = vmatpush1.msra.mxu1 %v222_v34  ;;  %v270_v15 = vld [vmem:[%s1427_s3 + $0x230] sm:$0xff]  ;;  %v263_v16 = vld [vmem:[%s1427_s3 + $0x1f8] sm:$0xff]  ;;  %v269_v17 = vld [vmem:[%s1427_s3 + $0x228] sm:$0xff] }
  0x25   : > { %637 = vmatpush1.msra.mxu0 %v292_v35  ;;  %573 = vmatprep.subr.mxu1 %v221_v36  ;;  %v262_v18 = vld [vmem:[%s1427_s3 + $0x1f0] sm:$0xff]  ;;  %v268_v19 = vld [vmem:[%s1427_s3 + $0x220] sm:$0xff]  ;;  %v261_v20 = vld [vmem:[%s1427_s3 + $0x1e8] sm:$0xff] }
  0x26   : > { %638 = vmatprep.subr.mxu0 %v291_v37  ;;  %574 = vmatpush1.msra.mxu1 %v220_v38  ;;  %v267_v22 = vld [vmem:[%s1427_s3 + $0x218] sm:$0xff]  ;;  %v260_v23 = vld [vmem:[%s1427_s3 + $0x1e0] sm:$0xff]  ;;  %v266_v24 = vld [vmem:[%s1427_s3 + $0x210] sm:$0xff] }
  0x27   : > { %639 = vmatpush1.msra.mxu0 %v290_v39  ;;  %575 = vmatprep.subr.mxu1 %v219_v40  ;;  %v259_v25 = vld [vmem:[%s1427_s3 + $0x1d8] sm:$0xff]  ;;  %v265_v26 = vld [vmem:[%s1427_s3 + $0x208] sm:$0xff]  ;;  %v258_v27 = vld [vmem:[%s1427_s3 + $0x1d0] sm:$0xff] }
  0x28   : > { %640 = vmatprep.subr.mxu0 %v289_v41  ;;  %576 = vmatpush1.msra.mxu1 %v218_v42  ;;  %v264_v28 = vld [vmem:[%s1427_s3 + $0x200] sm:$0xff]  ;;  %v257_v29 = vld [vmem:[%s1427_s3 + $0x1c8] sm:$0xff]  ;;  %v327_v30 = vld [vmem:[%s1427_s3 + $0x3f8] sm:$0xff] }
  0x29   : > { %641 = vmatpush1.msra.mxu0 %v288_v43  ;;  %577 = vmatprep.subr.mxu1 %v217_v44  ;;  %v256_v31 = vld [vmem:[%s1427_s3 + $0x1c0] sm:$0xff]  ;;  %v326_v32 = vld [vmem:[%s1427_s3 + $0x3f0] sm:$0xff]  ;;  %v255_v33 = vld [vmem:[%s1427_s3 + $0x1b8] sm:$0xff] }
  0x2a   : > { %642 = vmatprep.subr.mxu0 %v287_v45  ;;  %578 = vmatpush1.msra.mxu1 %v216_v46  ;;  %v325_v34 = vld [vmem:[%s1427_s3 + $0x3e8] sm:$0xff]  ;;  %v254_v35 = vld [vmem:[%s1427_s3 + $0x1b0] sm:$0xff]  ;;  %v324_v36 = vld [vmem:[%s1427_s3 + $0x3e0] sm:$0xff] }
  0x2b   : > { %643 = vmatpush1.msra.mxu0 %v286_v47  ;;  %579 = vmatprep.subr.mxu1 %v215_v48  ;;  %v253_v37 = vld [vmem:[%s1427_s3 + $0x1a8] sm:$0xff]  ;;  %v323_v38 = vld [vmem:[%s1427_s3 + $0x3d8] sm:$0xff]  ;;  %v252_v39 = vld [vmem:[%s1427_s3 + $0x1a0] sm:$0xff] }
  0x2c   : > { %644 = vmatprep.subr.mxu0 %v285_v49  ;;  %580 = vmatpush1.msra.mxu1 %v214_v50  ;;  %v322_v40 = vld [vmem:[%s1427_s3 + $0x3d0] sm:$0xff]  ;;  %v251_v41 = vld [vmem:[%s1427_s3 + $0x198] sm:$0xff]  ;;  %v321_v42 = vld [vmem:[%s1427_s3 + $0x3c8] sm:$0xff] }
  0x2d   : > { %645 = vmatpush1.msra.mxu0 %v284_v51  ;;  %581 = vmatprep.subr.mxu1 %v213_v52  ;;  %v250_v43 = vld [vmem:[%s1427_s3 + $0x190] sm:$0xff]  ;;  %v320_v44 = vld [vmem:[%s1427_s3 + $0x3c0] sm:$0xff]  ;;  %v249_v45 = vld [vmem:[%s1427_s3 + $0x188] sm:$0xff] }
  0x2e   : > { %646 = vmatprep.subr.mxu0 %v283_v53  ;;  %582 = vmatpush1.msra.mxu1 %v212_v54  ;;  %v319_v46 = vld [vmem:[%s1427_s3 + $0x3b8] sm:$0xff]  ;;  %v248_v47 = vld [vmem:[%s1427_s3 + $0x180] sm:$0xff]  ;;  %v318_v48 = vld [vmem:[%s1427_s3 + $0x3b0] sm:$0xff] }
  0x2f   : > { %647 = vmatpush1.msra.mxu0 %v282_v55  ;;  %583 = vmatprep.subr.mxu1 %v211_v56  ;;  %v247_v49 = vld [vmem:[%s1427_s3 + $0x178] sm:$0xff]  ;;  %v317_v50 = vld [vmem:[%s1427_s3 + $0x3a8] sm:$0xff]  ;;  %v246_v51 = vld [vmem:[%s1427_s3 + $0x170] sm:$0xff] }
  0x30   : > { %648 = vmatprep.subr.mxu0 %v281_v57  ;;  %584 = vmatpush1.msra.mxu1 %v210_v58  ;;  %v316_v52 = vld [vmem:[%s1427_s3 + $0x3a0] sm:$0xff]  ;;  %v245_v53 = vld [vmem:[%s1427_s3 + $0x168] sm:$0xff]  ;;  %v315_v54 = vld [vmem:[%s1427_s3 + $0x398] sm:$0xff] }
  0x31   : > { %649 = vmatpush1.msra.mxu0 %v280_v59  ;;  %585 = vmatprep.subr.mxu1 %v209_v60  ;;  %v244_v55 = vld [vmem:[%s1427_s3 + $0x160] sm:$0xff]  ;;  %v314_v56 = vld [vmem:[%s1427_s3 + $0x390] sm:$0xff]  ;;  %v243_v57 = vld [vmem:[%s1427_s3 + $0x158] sm:$0xff] }
  0x32   : > { %650 = vmatprep.subr.mxu0 %v279_v61  ;;  %586 = vmatpush1.msra.mxu1 %v208_v62  ;;  %v313_v58 = vld [vmem:[%s1427_s3 + $0x388] sm:$0xff]  ;;  %v242_v59 = vld [vmem:[%s1427_s3 + $0x150] sm:$0xff]  ;;  %v312_v60 = vld [vmem:[%s1427_s3 + $0x380] sm:$0xff] }
  0x33   : > { %651 = vmatpush1.msra.mxu0 %v278_v63  ;;  %587 = vmatprep.subr.mxu1 %v207_v0  ;;  %v241_v61 = vld [vmem:[%s1427_s3 + $0x148] sm:$0xff]  ;;  %v311_v62 = vld [vmem:[%s1427_s3 + $0x378] sm:$0xff]  ;;  %v240_v63 = vld [vmem:[%s1427_s3 + $0x140] sm:$0xff] }
  0x34   : > { %652 = vmatprep.subr.mxu0 %v277_v1  ;;  %588 = vmatpush1.msra.mxu1 %v206_v2  ;;  %v310_v0 = vld [vmem:[%s1427_s3 + $0x370] sm:$0xff]  ;;  %v239_v1 = vld [vmem:[%s1427_s3 + $0x138] sm:$0xff]  ;;  %v309_v2 = vld [vmem:[%s1427_s3 + $0x368] sm:$0xff] }
  0x35   : > { %653 = vmatpush1.msra.mxu0 %v276_v3  ;;  %589 = vmatprep.subr.mxu1 %v205_v4  ;;  %v308_v3 = vld [vmem:[%s1427_s3 + $0x360] sm:$0xff]  ;;  %v307_v4 = vld [vmem:[%s1427_s3 + $0x358] sm:$0xff]  ;;  %vm786_vm7 = vmor %vm785_vm6, %vm784_vm5 }
  0x36   : > { %654 = vmatprep.subr.mxu0 %v275_v5  ;;  %590 = vmatpush1.msra.mxu1 %v204_v6  ;;  %v306_v5 = vld [vmem:[%s1427_s3 + $0x350] sm:$0xff]  ;;  %v305_v6 = vld [vmem:[%s1427_s3 + $0x348] sm:$0xff] }
  0x37   : > { %655 = vmatpush1.msra.mxu0 %v274_v7  ;;  %591 = vmatprep.subr.mxu1 %v203_v8  ;;  %v304_v7 = vld [vmem:[%s1427_s3 + $0x340] sm:$0xff]  ;;  %v238_v8 = vld [vmem:[%s1427_s3 + $0x130] sm:$0xff] }
  0x38   : > { %656 = vmatprep.subr.mxu0 %v273_v9  ;;  %592 = vmatpush1.msra.mxu1 %v202_v10  ;;  %v303_v9 = vld [vmem:[%s1427_s3 + $0x338] sm:$0xff]  ;;  %v237_v10 = vld [vmem:[%s1427_s3 + $0x128] sm:$0xff] }
  0x39   : > { %657 = vmatpush1.msra.mxu0 %v272_v11  ;;  %593 = vmatprep.subr.mxu1 %v201_v12  ;;  %v302_v11 = vld [vmem:[%s1427_s3 + $0x330] sm:$0xff]  ;;  %v236_v12 = vld [vmem:[%s1427_s3 + $0x120] sm:$0xff] }
  0x3a   : > { %658 = vmatprep.subr.mxu0 %v271_v13  ;;  %594 = vmatpush1.msra.mxu1 %v200_v14  ;;  %v301_v13 = vld [vmem:[%s1427_s3 + $0x328] sm:$0xff]  ;;  %v235_v14 = vld [vmem:[%s1427_s3 + $0x118] sm:$0xff] }
  0x3b   : > { %659 = vmatpush1.msra.mxu0 %v270_v15  ;;  %595 = vmatprep.subr.mxu1 %v263_v16  ;;  %v300_v15 = vld [vmem:[%s1427_s3 + $0x320] sm:$0xff]  ;;  %v234_v16 = vld [vmem:[%s1427_s3 + $0x110] sm:$0xff] }
  0x3c   : > { %660 = vmatprep.subr.mxu0 %v269_v17  ;;  %596 = vmatpush2.msra.mxu1 %v262_v18  ;;  %v299_v17 = vld [vmem:[%s1427_s3 + $0x318] sm:$0xff]  ;;  %v233_v18 = vld [vmem:[%s1427_s3 + $0x108] sm:$0xff] }
  0x3d   : > { %661 = vmatpush1.msra.mxu0 %v268_v19  ;;  %597 = vmatprep.subr.mxu1 %v261_v20  ;;  %v298_v19 = vld [vmem:[%s1427_s3 + $0x310] sm:$0xff]  ;;  %v232_v20 = vld [vmem:[%s1427_s3 + $0x100] sm:$0xff] }
  0x3e   : > { %662 = vmatprep.subr.mxu0 %v267_v22  ;;  %598 = vmatpush2.msra.mxu1 %v260_v23  ;;  %v297_v22 = vld [vmem:[%s1427_s3 + $0x308] sm:$0xff]  ;;  %v296_v23 = vld [vmem:[%s1427_s3 + $0x300] sm:$0xff] }
  0x3f   : > { %663 = vmatpush1.msra.mxu0 %v266_v24  ;;  %599 = vmatprep.subr.mxu1 %v259_v25  ;;  %v343_v24 = vld [vmem:[%s1427_s3 + $0x478] sm:$0xff] }
  0x40   : > { %664 = vmatprep.subr.mxu0 %v265_v26  ;;  %600 = vmatpush2.msra.mxu1 %v258_v27 }
  0x41   : > { %665 = vmatpush1.msra.mxu0 %v264_v28  ;;  %601 = vmatprep.subr.mxu1 %v257_v29 }
  0x42   : > { %666 = vmatprep.subr.mxu0 %v327_v30  ;;  %602 = vmatpush2.msra.mxu1 %v256_v31 }
  0x43   : > { %667 = vmatpush2.msra.mxu0 %v326_v32  ;;  %603 = vmatprep.subr.mxu1 %v255_v33 }
  0x44   : > { %668 = vmatprep.subr.mxu0 %v325_v34  ;;  %604 = vmatpush2.msra.mxu1 %v254_v35 }
  0x45   : > { %669 = vmatpush2.msra.mxu0 %v324_v36  ;;  %605 = vmatprep.subr.mxu1 %v253_v37 }
  0x46   : > { %670 = vmatprep.subr.mxu0 %v323_v38  ;;  %606 = vmatpush2.msra.mxu1 %v252_v39 }
  0x47   : > { %671 = vmatpush2.msra.mxu0 %v322_v40  ;;  %607 = vmatprep.subr.mxu1 %v251_v41  ;;  %v342_v41 = vld [vmem:[%s1427_s3 + $0x470] sm:$0xff] }
  0x48   : > { %672 = vmatprep.subr.mxu0 %v321_v42  ;;  %608 = vmatpush2.msra.mxu1 %v250_v43  ;;  %v341_v43 = vld [vmem:[%s1427_s3 + $0x468] sm:$0xff] }
  0x49   : > { %673 = vmatpush2.msra.mxu0 %v320_v44  ;;  %609 = vmatprep.subr.mxu1 %v249_v45  ;;  %v340_v45 = vld [vmem:[%s1427_s3 + $0x460] sm:$0xff] }
  0x4a   : > { %674 = vmatprep.subr.mxu0 %v319_v46  ;;  %610 = vmatpush2.msra.mxu1 %v248_v47  ;;  %v339_v46 = vld [vmem:[%s1427_s3 + $0x458] sm:$0xff]  ;;  %v338_v47 = vld [vmem:[%s1427_s3 + $0x450] sm:$0xff] }
  0x4b   : > { %675 = vmatpush2.msra.mxu0 %v318_v48  ;;  %611 = vmatprep.subr.mxu1 %v247_v49  ;;  %v337_v49 = vld [vmem:[%s1427_s3 + $0x448] sm:$0xff] }
  0x4c   : > { %676 = vmatprep.subr.mxu0 %v317_v50  ;;  %612 = vmatpush2.msra.mxu1 %v246_v51  ;;  %v336_v50 = vld [vmem:[%s1427_s3 + $0x440] sm:$0xff] }
  0x4d   : > { %677 = vmatpush2.msra.mxu0 %v316_v52  ;;  %613 = vmatprep.subr.mxu1 %v245_v53  ;;  %v334_v52 = vld [vmem:[%s1427_s3 + $0x430] sm:$0xff] }
  0x4e   : > { %678 = vmatprep.subr.mxu0 %v315_v54  ;;  %614 = vmatpush2.msra.mxu1 %v244_v55  ;;  %v333_v54 = vld [vmem:[%s1427_s3 + $0x428] sm:$0xff]  ;;  %v332_v55 = vld [vmem:[%s1427_s3 + $0x420] sm:$0xff] }
  0x4f   : > { %679 = vmatpush2.msra.mxu0 %v314_v56  ;;  %615 = vmatprep.subr.mxu1 %v243_v57  ;;  %v331_v56 = vld [vmem:[%s1427_s3 + $0x418] sm:$0xff] }
  0x50   : > { %680 = vmatprep.subr.mxu0 %v313_v58  ;;  %616 = vmatpush2.msra.mxu1 %v242_v59  ;;  %v330_v58 = vld [vmem:[%s1427_s3 + $0x410] sm:$0xff]  ;;  %v329_v59 = vld [vmem:[%s1427_s3 + $0x408] sm:$0xff] }
  0x51   : > { %681 = vmatpush2.msra.mxu0 %v312_v60  ;;  %617 = vmatprep.subr.mxu1 %v241_v61  ;;  %v328_v60 = vld [vmem:[%s1427_s3 + $0x400] sm:$0xff] }
  0x52   : > { %682 = vmatprep.subr.mxu0 %v311_v62  ;;  %618 = vmatpush2.msra.mxu1 %v240_v63 }
  0x53   : > { %683 = vmatpush2.msra.mxu0 %v310_v0  ;;  %619 = vmatprep.subr.mxu1 %v239_v1 }
  0x54   : > { %684 = vmatprep.subr.mxu0 %v309_v2  ;;  %620 = vmatpush2.msra.mxu1 %v238_v8 }
  0x55   : > { %685 = vmatpush2.msra.mxu0 %v308_v3  ;;  %621 = vmatprep.subr.mxu1 %v237_v10 }
  0x56   : > { %686 = vmatprep.subr.mxu0 %v307_v4  ;;  %622 = vmatpush2.msra.mxu1 %v236_v12 }
  0x57   : > { %687 = vmatpush2.msra.mxu0 %v306_v5  ;;  %623 = vmatprep.subr.mxu1 %v235_v14 }
  0x58   : > { %688 = vmatprep.subr.mxu0 %v305_v6  ;;  %624 = vmatpush2.msra.mxu1 %v234_v16 }
  0x59   : > { %689 = vmatpush2.msra.mxu0 %v304_v7  ;;  %625 = vmatprep.subr.mxu1 %v233_v18 }
  0x5a   : > { %690 = vmatprep.subr.mxu0 %v303_v9  ;;  %626 = vmatpush2.msra.mxu1 %v232_v20 }
  0x5b   : > { %691 = vmatpush2.msra.mxu0 %v302_v11  ;;  %721 = vmatprep.subr.mxu1 %v343_v24 }
  0x5c   : > { %692 = vmatprep.subr.mxu0 %v301_v13 }
  0x5d   : > { %693 = vmatpush2.msra.mxu0 %v300_v15 }
  0x5e   : > { %694 = vmatprep.subr.mxu0 %v299_v17 }
  0x5f   : > { %695 = vmatpush2.msra.mxu0 %v298_v19 }
  0x60   : > { %696 = vmatprep.subr.mxu0 %v297_v22 }
  0x61   : > { %697 = vmatpush2.msra.mxu0 %v296_v23 }
  0x89   : > { %v348_v25 = vpop.permute.xlu0 %347 }
  0xda   : > { %v466_v26 = vpop.f32.mrf.mxu0  ;;  %v507_v27 = vpop.f32.mrf.mxu1 }
  0xdb   : > { %v508_v28 = vadd.f32 %v507_v27, %v348_v25  ;;  %v467_v29 = vadd.f32 %v466_v26, %v348_v25 }
  0xdc   : > { %v468_v30 = vpop.f32.mrf.mxu0  ;;  %v509_v31 = vpop.f32.mrf.mxu1 }
  0xdd   : > { %v469_v32 = vadd.f32 %v468_v30, %v348_v25  ;;  %v510_v33 = vadd.f32 %v509_v31, %v348_v25  ;;  %v556_v34 = vmax.f32 %v508_v28, 0.0  ;;  %v554_v39 = vmax.f32 %v467_v29, 0.0 }
  0xde   : > { %v470_v35 = vpop.f32.mrf.mxu0  ;;  %v511_v36 = vpop.f32.mrf.mxu1 }
  0xdf   : > { %v555_v37 = vmax.f32 %v469_v32, 0.0  ;;  %v557_v38 = vmax.f32 %v510_v33, 0.0 }
  0xe0   : > { %v471_v40 = vpop.f32.mrf.mxu0  ;;  %v512_v42 = vpop.f32.mrf.mxu1 }
  0xe1   : > { %627 = vmatprep.mubr.f32.mxu1 %v555_v37  ;;  %698 = vmatprep.mubr.f32.mxu0 %v557_v38 }
  0xe2   : > { %v548_v44 = vpop.f32.mrf.mxu0  ;;  %628 = vmatmul.mubr.f32.vlgmr.msra.gmra.mxu1 %v554_v39  ;;  %699 = vmatmul.mubr.f32.vlgmr.msra.gmra.mxu0 %v556_v34 }
  0xe3   : > { %722 = vmatpush1.msra.mxu1 %v342_v41  ;;  %769 = vmatprep.mubr.f32.mxu1 %v919_v21  ;;  %v335_v21 = vld [vmem:[%s1427_s3 + $0x438] sm:$0xff]  ;;  %v549_v57 = vadd.f32 %v548_v44, %v348_v25 }
  0xe4   : > { %723 = vmatprep.subr.mxu1 %v341_v43  ;;  %v879_v48 = vpop.f32.mrf.mxu0 }
  0xe5   : > { %724 = vmatpush1.msra.mxu1 %v340_v45  ;;  %v558_v61 = vmax.f32 %v549_v57, 0.0 }
  0xe6   : > { %725 = vmatprep.subr.mxu1 %v339_v46  ;;  %v551_v51 = vpop.f32.mrf.mxu0 }
  0xe7   : > { %726 = vmatpush1.msra.mxu1 %v338_v47 }
  0xe8   : > { %727 = vmatprep.subr.mxu1 %v337_v49  ;;  %v880_v53 = vpop.f32.mrf.mxu0 }
  0xe9   : > { %728 = vmatpush1.msra.mxu1 %v336_v50 }
  0xea   : > { %729 = vmatprep.subr.mxu1 %v335_v21 }
  0xeb   : > { %730 = vmatpush1.msra.mxu1 %v334_v52 }
  0xec   : > { %731 = vmatprep.subr.mxu1 %v333_v54 }
  0xed   : > { %732 = vmatpush1.msra.mxu1 %v332_v55 }
  0xee   : > { %733 = vmatprep.subr.mxu1 %v331_v56 }
  0xef   : > { %734 = vmatpush1.msra.mxu1 %v330_v58 }
  0xf0   : > { %735 = vmatprep.subr.mxu1 %v329_v59 }
  0xf1   : > { %736 = vmatpush1.msra.mxu1 %v328_v60 }
  0xf2   : > { %864 = vmatmul.mubr.msk.f32.vlgmr.msra.gmra.mxu1 %vm559_vm4, %v558_v61 }
 0x1a2   : > { %v629_v62 = vpop.f32.mrf.mxu1  ;;  %v700_v63 = vpop.f32.mrf.mxu0 }
 0x1a3   : > { %v701_v3 = vadd.f32 %v700_v63, %v629_v62 }
 0x1a4   : > { %v631_v0 = vpop.f32.mrf.mxu1  ;;  %v702_v1 = vpop.f32.mrf.mxu0 }
 0x1a5   : > { %v703_v4 = vadd.f32 %v702_v1, %v631_v0 }
 0x1b2   : > { %v771_v2 = vpop.f32.mrf.mxu1 }
 0x1b3   : > { %v772_v6 = vadd.f32 %v771_v2, %v701_v3 }
 0x1b4   : > { %v773_v5 = vpop.f32.mrf.mxu1 }
 0x1b5   : > { %v774_v7 = vadd.f32 %v773_v5, %v703_v4 }
 0x1b7   : > { %v869_v8 = vpack.c.bf16 %v774_v7, %v772_v6 }
 0x1b9   : > { %787 = vst.msk [vmem:[%s197_s28] sm:$0x77] %vm786_vm7, %v869_v8 }
 0x1ba PF: > { %s14_s15 = sadd.s32 1, %s915_s15  }
 0x1bb   : > { %p11_p4 = scmp.ge.s32.totalorder %s14_s15, 4  }
 0x1bd   :  { %13 = sbr.rel (!%p11_p4) target bundleno = 1 (0x1), region = 66 }

// kernel: quant_lenet5_forward.4
= control target key start
LH: loop header
LB: loop body
LE: loop exit
PB: predicated region body
PF: predicated region fallthrough
CT: control target
= control target key end

     0   :  { %s622_s15 = smov 0   ;;  %s691_s0 = inlined_call_operand.vmem [shape: bf16[2,150,64], index: 0, kind: input, shape index: {}]   ;;  %s692_s1 = inlined_call_operand.vmem [shape: bf16[16,150], index: 1, kind: input, shape index: {}]   ;;  %s693_s2 = inlined_call_operand.vmem [shape: f32[16,1], index: 2, kind: input, shape index: {}]   ;;  %s694_s3 = inlined_call_operand.vmem [shape: f32[64,16], index: 3, kind: input, shape index: {}]   ;;  %s695_s4 = inlined_call_operand.vmem [shape: bf16[2,16,16], index: 4, kind: output, shape index: {}]  }
   0x1 LB: > { %s505_s16 = sadd.s32 4294967295, %s594_s15   ;;  %p509_p0 = scmp.ge.s32.totalorder %s594_s15, 1  ;;  %s594_s15 = sphi %s622_s15, %s14_s15  }
   0x2   : > { %p162_p1 = scmp.lt.s32.totalorder %s594_s15, 3 }
   0x4   : > { %p163_p2 = pnand %p509_p0, %p162_p1 }
   0x5   : > { %p188_p3 = scmp.lt.s32.totalorder (!%p163_p2), %s505_s16, 1 }
   0x6   : > { %166 = sbr.rel (%p163_p2) target bundleno = 454 (0x1c6), region = 36 }
   0xb   : > { %vm306_vm0 = vcmask 179200   ;;  %v596_v0 = vmov 0   ;;  %v587_v1 = vld [vmem:[%s692_s1 + $0x4] ss:$8 sps:$4 sm:$0xff]   ;;  %s697_s16 = smov (!%p188_p3, %s505_s16), 1  ;;  %v208_v3 = vld [vmem:[%s694_s3 + $0x38] sm:$0xff] }
   0xc   : > { %314 = vmatprep.subr.bf16.mxu0 %v596_v0  ;;  %574 = vset.pattern.permute.xlu0 %v596_v0  ;;  %v209_v2 = vld [vmem:[%s693_s2] sm:$0xff]  ;;  %v207_v4 = vld [vmem:[%s694_s3 + $0x30] sm:$0xff]  ;;  %v210_v5 = vld [vmem:[%s693_s2 + $0x8] sm:$0xff]  ;;  %s564_s27 = smul.u32 76, %s697_s16  ;;  %vm310_vm1 = vcmask 1042432   ;;  %vm357_vm2 = vcmask 523264  }
   0xd   : > { %213 = vperm.xlu0 %574, %v209_v2   ;;  %525 = vmatprep.mubr.msk.bf16.mxu0 %vm306_vm0, %v587_v1  ;;  %v206_v6 = vld [vmem:[%s694_s3 + $0x28] sm:$0xff]  ;;  %v205_v7 = vld [vmem:[%s694_s3 + $0x20] sm:$0xff]  ;;  %v204_v20 = vld [vmem:[%s694_s3 + $0x18] sm:$0xff]  ;;  %s532_s21 = sshll.u32 %s697_s16, 3  ;;  %vm447_vm3 = vcmask 125952  }
   0xe   : > { %545 = vmatprep.subr.mxu1 %v208_v3  ;;  %s654_s6 = scalar_lea.vmem %s691_s0, %s564_s27  ;;  %v585_v19 = vld [vmem:[%s692_s1] ss:$8 sps:$4 sm:$0xff]   ;;  %v203_v21 = vld [vmem:[%s694_s3 + $0x10] sm:$0xff]  ;;  %s197_s24 = scalar_lea.vmem %s695_s4, %s532_s21 }
   0xf   : > { %546 = vmatpush3.msra.mxu1 %v208_v3  ;;  %v575_v8 = vld [vmem:[%s654_s6 + $0x38] sm:$0xff]   ;;  %v576_v9 = vld [vmem:[%s654_s6 + $0x30] sm:$0xff]   ;;  %v577_v10 = vld [vmem:[%s654_s6 + $0x28] sm:$0xff]  }
  0x10   : > { %547 = vmatprep.subr.mxu1 %v207_v4  ;;  %315 = vmatpush1.bf16.msra.mxu0 %v575_v8  ;;  %v578_v11 = vld [vmem:[%s654_s6 + $0x20] sm:$0xff]   ;;  %v579_v12 = vld [vmem:[%s654_s6 + $0x18] sm:$0xff]   ;;  %v580_v13 = vld [vmem:[%s654_s6 + $0x10] sm:$0xff]  }
  0x11   : > { %218 = vperm.xlu0 %574, %v210_v5   ;;  %548 = vmatpush3.msra.mxu1 %v207_v4  ;;  %v581_v14 = vld [vmem:[%s654_s6 + $0x8] sm:$0xff]   ;;  %v582_v15 = vld [vmem:[%s654_s6] sm:$0xff]  }
  0x12   : > { %549 = vmatprep.subr.mxu1 %v206_v6  ;;  %316 = vmatprep.subr.bf16.mxu0 %v596_v0  ;;  %v583_v16 = vld [vmem:[%s654_s6 + $0x48] ss:$0 sps:$4 sm:$0x77]   ;;  %v584_v18 = vld [vmem:[%s654_s6 + $0x40] sm:$0xff]  }
  0x13   : > { %550 = vmatpush3.msra.mxu1 %v206_v6  ;;  %v312_v17 = vsel %vm310_vm1, %v583_v16, 0  ;;  %v202_v22 = vld [vmem:[%s694_s3 + $0x8] sm:$0xff]  ;;  %v201_v23 = vld [vmem:[%s694_s3] sm:$0xff] }
  0x14   : > { %551 = vmatprep.subr.mxu1 %v205_v7  ;;  %317 = vmatpush1.bf16.msra.mxu0 %v576_v9 }
  0x15   : > { %552 = vmatpush3.msra.mxu1 %v205_v7  ;;  %318 = vmatprep.subr.bf16.mxu0 %v596_v0 }
  0x16   : > { %553 = vmatprep.subr.mxu1 %v204_v20 }
  0x17   : > { %554 = vmatpush3.msra.mxu1 %v204_v20 }
  0x18   : > { %319 = vmatpush1.bf16.msra.mxu0 %v577_v10  ;;  %555 = vmatprep.subr.mxu1 %v203_v21 }
  0x19   : > { %320 = vmatprep.subr.bf16.mxu0 %v596_v0  ;;  %556 = vmatpush3.msra.mxu1 %v203_v21 }
  0x1a   : > { %557 = vmatprep.subr.mxu1 %v202_v22 }
  0x1b   : > { %558 = vmatpush3.msra.mxu1 %v202_v22 }
  0x1c   : > { %321 = vmatpush1.bf16.msra.mxu0 %v578_v11  ;;  %559 = vmatprep.subr.mxu1 %v201_v23 }
  0x1d   : > { %322 = vmatprep.subr.bf16.mxu0 %v596_v0  ;;  %560 = vmatpush3.msra.mxu1 %v201_v23 }
  0x20   : > { %323 = vmatpush1.bf16.msra.mxu0 %v579_v12 }
  0x21   : > { %324 = vmatprep.subr.bf16.mxu0 %v596_v0 }
  0x24   : > { %325 = vmatpush1.bf16.msra.mxu0 %v580_v13 }
  0x25   : > { %326 = vmatprep.subr.bf16.mxu0 %v596_v0 }
  0x28   : > { %327 = vmatpush1.bf16.msra.mxu0 %v581_v14 }
  0x29   : > { %328 = vmatprep.subr.bf16.mxu0 %v596_v0 }
  0x2c   : > { %329 = vmatpush1.bf16.msra.mxu0 %v582_v15 }
  0x2d   : > { %342 = vmatprep.subr.bf16.mxu0 %v596_v0 }
  0x30   : > { %343 = vmatpush2.bf16.msra.mxu0 %v312_v17 }
  0x31   : > { %344 = vmatprep.subr.bf16.mxu0 %v596_v0 }
  0x34   : > { %345 = vmatpush2.bf16.msra.mxu0 %v584_v18 }
  0x37   : > { %347 = vmatmul.mubr.bf16.vlgmr.msra.gmra.mxu0 %v585_v19 }
  0x88   : > { %v214_v24 = vpop.permute.xlu0 %213 }
  0x8c   : > { %v219_v29 = vpop.permute.xlu0 %218 }
  0xf7   : > { %v348_v25 = vpop.f32.mrf.mxu0 }
  0xf8   : > { %v349_v26 = vadd.f32 %v348_v25, %v214_v24 }
  0xf9   : > { %v350_v27 = vpop.f32.mrf.mxu0 }
  0xfa   : > { %v355_v28 = vmax.f32 %v349_v26, 0.0 }
  0xfb   : > { %v351_v30 = vpop.f32.mrf.mxu0 }
  0xfc   : > { %v352_v31 = vadd.f32 %v351_v30, %v219_v29  ;;  %561 = vmatprep.mubr.msk.f32.mxu1 %vm357_vm2, %v355_v28 }
  0xfd   : > { %v353_v32 = vpop.f32.mrf.mxu0 }
  0xfe   : > { %v356_v33 = vmax.f32 %v352_v31, 0.0 }
 0x100   : > { %562 = vmatmul.mubr.msk.f32.vlgmr.msra.gmra.mxu1 %vm357_vm2, %v356_v33 }
 0x1c0   : > { %v563_v34 = vpop.f32.mrf.mxu1 }
 0x1c1   : > { %v534_v35 = vpack.c.bf16 %v563_v34, %v563_v34 }
 0x1c2   : > { %v430_v36 = vpop.f32.mrf.mxu1 }
 0x1c3   : > { %449 = vst.msk [vmem:[%s197_s24 + $0x4] sm:$0xf] %vm447_vm3, %v534_v35  ;;  %v533_v37 = vpack.c.bf16 %v430_v36, %v430_v36 }
 0x1c5   : > { %448 = vst.msk [vmem:[%s197_s24] sm:$0xf] %vm447_vm3, %v533_v37 }
 0x1c6 PF: > { %s14_s15 = sadd.s32 1, %s594_s15  }
 0x1c7   : > { %p11_p4 = scmp.ge.s32.totalorder %s14_s15, 4  }
 0x1c9   :  { %13 = sbr.rel (!%p11_p4) target bundleno = 1 (0x1), region = 66 }

// kernel: quant_lenet5_forward.5
= control target key start
LH: loop header
LB: loop body
LE: loop exit
PB: predicated region body
PF: predicated region fallthrough
CT: control target
= control target key end

     0   :  { %s963_s24 = smov 0   ;;  %s1110_s0 = inlined_call_operand.vmem [shape: bf16[16,256], index: 0, kind: input, shape index: {}]   ;;  %s1111_s1 = inlined_call_operand.vmem [shape: bf16[256,128], index: 1, kind: input, shape index: {}]   ;;  %s1112_s2 = inlined_call_operand.vmem [shape: f32[1,128], index: 2, kind: input, shape index: {}]   ;;  %s1113_s3 = inlined_call_operand.vmem [shape: bf16[128,128], index: 3, kind: input, shape index: {}]   ;;  %s1114_s4 = inlined_call_operand.vmem [shape: f32[1,128], index: 4, kind: input, shape index: {}]   ;;  %s1115_s5 = inlined_call_operand.vmem [shape: bf16[128,128], index: 5, kind: input, shape index: {}]   ;;  %s1116_s6 = inlined_call_operand.vmem [shape: f32[1,128], index: 6, kind: input, shape index: {}]   ;;  %s1117_s7 = inlined_call_operand.vmem [shape: f32[16,128], index: 7, kind: output, shape index: {}]  }
   0x1 LB: > { %s741_s25 = sadd.s32 4294967295, %s919_s24   ;;  %p745_p0 = scmp.ge.s32.totalorder %s919_s24, 1  ;;  %s919_s24 = sphi %s963_s24, %s17_s24  }
   0x2   : > { %p237_p1 = scmp.lt.s32.totalorder %s919_s24, 3 }
   0x4   : > { %p238_p2 = pnand %p745_p0, %p237_p1 }
   0x5   : > { %p268_p3 = scmp.lt.s32.totalorder (!%p238_p2), %s741_s25, 1 }
   0x6   : > { %241 = sbr.rel (%p238_p2) target bundleno = 645 (0x285), region = 48 }
   0xb   : > { %v879_v0 = vld [vmem:[%s1111_s1 + $0x78] sm:$0xff]   ;;  %v881_v2 = vld [vmem:[%s1111_s1 + $0x70] sm:$0xff]   ;;  %v921_v3 = vmov 0.0   ;;  %v883_v5 = vld [vmem:[%s1111_s1 + $0x68] sm:$0xff]   ;;  %s1119_s25 = smov (!%p268_p3, %s741_s25), 1  ;;  %vm922_vm0 = vmmov 0  }
   0xc   : > { %v880_v1 = vld [vmem:[%s1111_s1 + $0x38] sm:$0xff]   ;;  %789 = vmatprep.subr.bf16.mxu0 %v879_v0  ;;  %829 = vmatprep.subr.bf16.mxu1 %v921_v3  ;;  %v882_v4 = vld [vmem:[%s1111_s1 + $0x30] sm:$0xff]   ;;  %v884_v6 = vld [vmem:[%s1111_s1 + $0x28] sm:$0xff]   ;;  %s788_s17 = sshll.u32 %s1119_s25, 3 }
   0xd   : > { %790 = vmatpush3.bf16.msra.mxu0 %v880_v1  ;;  %v885_v7 = vld [vmem:[%s1111_s1 + $0x60] sm:$0xff]   ;;  %v887_v9 = vld [vmem:[%s1111_s1 + $0x58] sm:$0xff]   ;;  %s272_s26 = scalar_lea.vmem %s1110_s0, %s788_s17  ;;  %v889_v11 = vld [vmem:[%s1111_s1 + $0x50] sm:$0xff]   ;;  %845 = vmatprep.mubr.msk.bf16.mxu1 %vm922_vm0, %v921_v3  ;;  %s276_s19 = scalar_lea.vmem %s1117_s7, %s788_s17 }
   0xe   : > { %791 = vmatprep.subr.bf16.mxu0 %v881_v2  ;;  %v886_v8 = vld [vmem:[%s1111_s1 + $0x20] sm:$0xff]   ;;  %v888_v10 = vld [vmem:[%s1111_s1 + $0x18] sm:$0xff]   ;;  %v890_v15 = vld [vmem:[%s1111_s1 + $0x10] sm:$0xff]  }
   0xf   : > { %v278_v12 = vld [vmem:[%s272_s26] sm:$0xff]  ;;  %v897_v14 = vld [vmem:[%s1113_s3 + $0x38] sm:$0xff]   ;;  %v891_v16 = vld [vmem:[%s1111_s1 + $0x48] sm:$0xff]  }
  0x10   : > { %v751_v13 = vcombine.high %v278_v12, %v278_v12  ;;  %830 = vmatpush3.bf16.msra.mxu1 %v897_v14  ;;  %v898_v17 = vld [vmem:[%s1113_s3 + $0x30] sm:$0xff]   ;;  %v892_v18 = vld [vmem:[%s1111_s1 + $0x8] sm:$0xff]   ;;  %v893_v19 = vld [vmem:[%s1111_s1 + $0x40] sm:$0xff]   ;;  %v750_v23 = vcombine.low %v278_v12, %v278_v12 }
  0x11   : > { %792 = vmatpush3.bf16.msra.mxu0 %v882_v4  ;;  %831 = vmatprep.subr.bf16.mxu1 %v921_v3  ;;  %v899_v20 = vld [vmem:[%s1113_s3 + $0x28] sm:$0xff]   ;;  %v894_v21 = vld [vmem:[%s1111_s1] sm:$0xff]   ;;  %v901_v24 = vld [vmem:[%s1113_s3 + $0x18] sm:$0xff]  }
  0x12   : > { %793 = vmatprep.subr.bf16.mxu0 %v883_v5  ;;  %453 = vmatprep.mubr.bf16.mxu0 %v751_v13  ;;  %v900_v22 = vld [vmem:[%s1113_s3 + $0x20] sm:$0xff]   ;;  %v902_v25 = vld [vmem:[%s1113_s3 + $0x10] sm:$0xff]   ;;  %v903_v26 = vld [vmem:[%s1113_s3 + $0x8] sm:$0xff]  }
  0x13   : > { %v904_v27 = vld [vmem:[%s1113_s3] sm:$0xff]   ;;  %v905_v28 = vld [vmem:[%s1115_s5 + $0x38] sm:$0xff]   ;;  %v906_v29 = vld [vmem:[%s1115_s5 + $0x30] sm:$0xff]  }
  0x14   : > { %832 = vmatpush3.bf16.msra.mxu1 %v898_v17  ;;  %v907_v30 = vld [vmem:[%s1115_s5 + $0x28] sm:$0xff]   ;;  %v908_v31 = vld [vmem:[%s1115_s5 + $0x20] sm:$0xff]   ;;  %v909_v32 = vld [vmem:[%s1115_s5 + $0x18] sm:$0xff]  }
  0x15   : > { %794 = vmatpush3.bf16.msra.mxu0 %v884_v6  ;;  %833 = vmatprep.subr.bf16.mxu1 %v921_v3  ;;  %v910_v33 = vld [vmem:[%s1115_s5 + $0x10] sm:$0xff]   ;;  %v749_v35 = vld [vmem:[%s1112_s2] ss:$0 sm:$0xff]  ;;  %v911_v43 = vld [vmem:[%s1115_s5 + $0x8] sm:$0xff]  }
  0x16   : > { %795 = vmatprep.subr.bf16.mxu0 %v885_v7  ;;  %v912_v44 = vld [vmem:[%s1115_s5] sm:$0xff]  }
  0x17   : > { %v768_v45 = vld [vmem:[%s1114_s4] ss:$0 sm:$0xff] }
  0x18   : > { %834 = vmatpush3.bf16.msra.mxu1 %v899_v20  ;;  %v777_v53 = vld [vmem:[%s1116_s6] ss:$0 sm:$0xff] }
  0x19   : > { %796 = vmatpush3.bf16.msra.mxu0 %v886_v8  ;;  %835 = vmatprep.subr.bf16.mxu1 %v921_v3 }
  0x1a   : > { %797 = vmatprep.subr.bf16.mxu0 %v887_v9 }
  0x1c   : > { %836 = vmatpush3.bf16.msra.mxu1 %v900_v22 }
  0x1d   : > { %798 = vmatpush3.bf16.msra.mxu0 %v888_v10  ;;  %837 = vmatprep.subr.bf16.mxu1 %v921_v3 }
  0x1e   : > { %799 = vmatprep.subr.bf16.mxu0 %v889_v11 }
  0x20   : > { %838 = vmatpush3.bf16.msra.mxu1 %v901_v24 }
  0x21   : > { %800 = vmatpush3.bf16.msra.mxu0 %v890_v15  ;;  %839 = vmatprep.subr.bf16.mxu1 %v921_v3 }
  0x22   : > { %801 = vmatprep.subr.bf16.mxu0 %v891_v16 }
  0x24   : > { %840 = vmatpush3.bf16.msra.mxu1 %v902_v25 }
  0x25   : > { %802 = vmatpush3.bf16.msra.mxu0 %v892_v18  ;;  %841 = vmatprep.subr.bf16.mxu1 %v921_v3 }
  0x26   : > { %803 = vmatprep.subr.bf16.mxu0 %v893_v19 }
  0x28   : > { %842 = vmatpush3.bf16.msra.mxu1 %v903_v26 }
  0x29   : > { %804 = vmatpush3.bf16.msra.mxu0 %v894_v21  ;;  %843 = vmatprep.subr.bf16.mxu1 %v921_v3 }
  0x2a   : > { %849 = vmatprep.subr.bf16.mxu0 %v921_v3 }
  0x2c   : > { %454 = vmatmul.mubr.bf16.vlgmr.msra.gmra.mxu0 %v750_v23  ;;  %844 = vmatpush3.bf16.msra.mxu1 %v904_v27 }
  0x2d   : > { %865 = vmatprep.mubr.msk.bf16.mxu0 %vm922_vm0, %v921_v3  ;;  %850 = vmatpush3.bf16.msra.mxu0 %v905_v28 }
  0x2e   : > { %851 = vmatprep.subr.bf16.mxu0 %v921_v3 }
  0x31   : > { %852 = vmatpush3.bf16.msra.mxu0 %v906_v29 }
  0x32   : > { %853 = vmatprep.subr.bf16.mxu0 %v921_v3 }
  0x35   : > { %854 = vmatpush3.bf16.msra.mxu0 %v907_v30 }
  0x36   : > { %855 = vmatprep.subr.bf16.mxu0 %v921_v3 }
  0x39   : > { %856 = vmatpush3.bf16.msra.mxu0 %v908_v31 }
  0x3a   : > { %857 = vmatprep.subr.bf16.mxu0 %v921_v3 }
  0x3d   : > { %858 = vmatpush3.bf16.msra.mxu0 %v909_v32 }
  0x3e   : > { %859 = vmatprep.subr.bf16.mxu0 %v921_v3 }
  0x41   : > { %860 = vmatpush3.bf16.msra.mxu0 %v910_v33 }
  0x42   : > { %861 = vmatprep.subr.bf16.mxu0 %v921_v3 }
  0x45   : > { %862 = vmatpush3.bf16.msra.mxu0 %v911_v43 }
  0x46   : > { %863 = vmatprep.subr.bf16.mxu0 %v921_v3 }
  0x49   : > { %864 = vmatpush3.bf16.msra.mxu0 %v912_v44 }
  0xec   : > { %v805_v34 = vpop.f32.mrf.mxu0 }
  0xee   : > { %v806_v36 = vpop.f32.mrf.mxu0 }
  0xef   : > { %v807_v37 = vadd.f32 %v806_v36, %v805_v34 }
  0xf0   : > { %v808_v38 = vpop.f32.mrf.mxu0 }
  0xf1   : > { %v456_v39 = vadd.f32 %v807_v37, %v749_v35 }
  0xf2   : > { %v809_v40 = vpop.f32.mrf.mxu0 }
  0xf3   : > { %v461_v41 = vmax.f32 %v456_v39, 0.0 }
  0xf5   : > { %v462_v42 = vpack.c.bf16 %v461_v41, %v461_v41 }
  0xf7   : > { %846 = vmatmul.mubr.bf16.vlgmr.msra.gmra.mxu1 %v462_v42 }
 0x1b7   : > { %v568_v46 = vpop.f32.mrf.mxu1 }
 0x1b8   : > { %v569_v47 = vadd.f32 %v768_v45, %v568_v46 }
 0x1b9   : > { %v847_v48 = vpop.f32.mrf.mxu1 }
 0x1ba   : > { %v574_v49 = vmax.f32 %v569_v47, 0.0 }
 0x1bb   : > { %v571_v50 = vpop.f32.mrf.mxu1 }
 0x1bc   : > { %v575_v51 = vpack.c.bf16 %v574_v49, %v574_v49 }
 0x1bd   : > { %v848_v52 = vpop.f32.mrf.mxu1 }
 0x1be   : > { %866 = vmatmul.mubr.bf16.vlgmr.msra.gmra.mxu0 %v575_v51 }
 0x27e   : > { %v681_v54 = vpop.f32.mrf.mxu0 }
 0x27f   : > { %v682_v55 = vadd.f32 %v777_v53, %v681_v54 }
 0x280   : > { %v867_v56 = vpop.f32.mrf.mxu0 }
 0x281   : > { %687 = vst [vmem:[%s276_s19] sm:$0xff] %v682_v55 }
 0x282   : > { %v684_v57 = vpop.f32.mrf.mxu0 }
 0x284   : > { %v868_v58 = vpop.f32.mrf.mxu0 }
 0x285 PF: > { %s17_s24 = sadd.s32 1, %s919_s24  }
 0x286   : > { %p14_p4 = scmp.ge.s32.totalorder %s17_s24, 4  }
 0x288   :  { %16 = sbr.rel (!%p14_p4) target bundleno = 1 (0x1), region = 78 }

</bundles_post_ra>
